<compile_context>
chip_gen: v7x
topology: tpu7x:2x2x1
jax: 0.10.0
libtpu: 0.0.40
codegen_flags: <defaults>
</compile_context>

<pallas_src>
import jax
import jax.numpy as jnp
from jax import lax
from jax.experimental import pallas as pl
from jax.experimental.pallas import tpu as pltpu


# ----------------------------------------------------------------------------
# Kernel
# ----------------------------------------------------------------------------
def _mlp_kernel(x_ref, w1_ref, b1_ref, w2_ref, b2_ref, w3_ref, b3_ref,
                w4_ref, b4_ref, o_ref):
    """Fused 4-layer MLP with the batch carried on the lane axis.

    x_ref : (tb, Kp)   batch rows, features zero-padded to Kp (multiple of 128)
    w1_ref: (H, Kp)    fc1 weight in (out, in) layout, feature-padded
    w2/w3 : (H, H)     fc2/fc3 weights in (out, in) layout
    w4_ref: (O, H)     fc4 weight in (out, in) layout
    b*_ref: (H, 1) / (O, 1)
    o_ref : (O, tb)    lane-dense output (batch on lanes)
    """
    # fc1: contract W1's in-dim with x's feature dim -> (H, tb).
    # Activations are lane-dense from here on.
    h = lax.dot_general(
        w1_ref[...], x_ref[...],
        dimension_numbers=(((1,), (1,)), ((), ())),
        preferred_element_type=jnp.float32,
    )
    h = jnp.tanh(h + b1_ref[...])                                       # EUP
    # fc2 + relu
    h = jnp.maximum(
        jnp.dot(w2_ref[...], h, preferred_element_type=jnp.float32) + b2_ref[...],
        0.0)
    # fc3 + relu
    h = jnp.maximum(
        jnp.dot(w3_ref[...], h, preferred_element_type=jnp.float32) + b3_ref[...],
        0.0)
    # fc4 -> (O, tb): already lane-dense, stored directly (unmasked vst).
    o_ref[...] = (
        jnp.dot(w4_ref[...], h, preferred_element_type=jnp.float32) + b4_ref[...]
    ).astype(o_ref.dtype)


# ----------------------------------------------------------------------------
# Tiling helpers
# ----------------------------------------------------------------------------
def _round_up(x, m):
    return ((x + m - 1) // m) * m


def _num_tensorcores_per_chip():
    """Megacore chips (v4 / v5p / v7x) expose 2 TensorCores; v5e/v6e expose 1."""
    try:
        kind = jax.devices()[0].device_kind.lower()
    except Exception:
        return 1
    for tag in ("v7", "v5p", "v4"):
        if tag in kind:
            return 2
    return 1


def _choose_tile(b_padded, tb, num_cores):
    """Batch tile (lane axis of the output block).

    * always a multiple of 128 (lane-dense, unmasked stores)
    * single TC (v5e/v6e): one big step -> no per-grid-step overhead
    * two TCs (v7x etc.): split so both cores get work; >=2 steps per core for
      larger batches so the x-tile DMA double-buffers behind compute.
    """
    if tb is not None:
        return max(128, _round_up(int(tb), 128))
    cap = 8192  # 8192x128 f32 tile = 4 MiB; double-buffered well under VMEM limits
    if num_cores >= 2 and b_padded >= 256:
        steps = max(4 if b_padded >= 1024 else 2, pl.cdiv(b_padded, cap))
    else:
        steps = pl.cdiv(b_padded, cap)
    return max(128, _round_up(pl.cdiv(b_padded, steps), 128))


# ----------------------------------------------------------------------------
# One-time capability probe for single-buffered constant operands
# ----------------------------------------------------------------------------
_SINGLE_BUFFER_OK = None


def _probe_single_buffer():
    """Check whether pipeline_mode=pl.Buffered(1) is supported on this jax."""
    global _SINGLE_BUFFER_OK
    if _SINGLE_BUFFER_OK is not None:
        return _SINGLE_BUFFER_OK

    def _k(x_ref, w_ref, o_ref):
        o_ref[...] = x_ref[...] + w_ref[...]

    try:
        const_spec = pl.BlockSpec((8, 128), lambda i: (0, 0),
                                  pipeline_mode=pl.Buffered(1))
        fn = pl.pallas_call(
            _k,
            out_shape=jax.ShapeDtypeStruct((16, 128), jnp.float32),
            grid=(2,),
            in_specs=[pl.BlockSpec((8, 128), lambda i: (i, 0)), const_spec],
            out_specs=pl.BlockSpec((8, 128), lambda i: (i, 0)),
        )
        jax.block_until_ready(fn(jnp.zeros((16, 128), jnp.float32),
                                 jnp.zeros((8, 128), jnp.float32)))
        _SINGLE_BUFFER_OK = True
    except Exception:
        _SINGLE_BUFFER_OK = False
    return _SINGLE_BUFFER_OK


# ----------------------------------------------------------------------------
# Wrapper
# ----------------------------------------------------------------------------
def ann_prediction_forward(x, params, *, tb=None):
    """Fused ANN_prediction forward.

    x: (B, num_inputs) float32.
    params: W1..W4 stored (in, out), b1..b4 stored (1, out).
    Returns (B, num_outputs) float32 matching the PyTorch module forward().
    """
    B, num_inputs = x.shape
    num_hiddens = params["W1"].shape[1]
    num_outputs = params["W4"].shape[1]

    # --- tiling --------------------------------------------------------------
    num_cores = _num_tensorcores_per_chip()
    Kp = _round_up(num_inputs, 128)            # feature dim -> clean 128 lanes
    Bp = _round_up(max(B, 128), 128)
    tile = _choose_tile(Bp, tb, num_cores)
    Bp = _round_up(Bp, tile)
    grid = (Bp // tile,)

    # --- operand prep (tiny, once per call) ----------------------------------
    # Padded batch rows are sliced off at the end; padded feature columns are
    # zero in both x and W1, so they do not change the result.
    xp = x
    if Bp != B or Kp != num_inputs:
        xp = jnp.pad(x, ((0, Bp - B), (0, Kp - num_inputs)))
    w1t = jnp.pad(params["W1"], ((0, Kp - num_inputs), (0, 0))).T     # (H, Kp)
    b1t = params["b1"].T                                              # (H, 1)
    w2t = params["W2"].T                                              # (H, H)
    b2t = params["b2"].T
    w3t = params["W3"].T
    b3t = params["b3"].T
    w4t = params["W4"].T                                              # (O, H)
    b4t = params["b4"].T                                              # (O, 1)

    # Grid-invariant operands: single-buffer if this jax supports it.
    const_kwargs = dict(pipeline_mode=pl.Buffered(1)) if _probe_single_buffer() else {}

    def const_spec(shape):
        return pl.BlockSpec(shape, lambda i: (0, 0), **const_kwargs)

    flops = 2 * Bp * (Kp * num_hiddens
                      + 2 * num_hiddens * num_hiddens
                      + num_hiddens * num_outputs)
    bytes_accessed = (
        Bp * Kp * 4 + Bp * num_outputs * 4
        + 4 * (Kp * num_hiddens + 2 * num_hiddens * num_hiddens
               + num_hiddens * num_outputs + 3 * num_hiddens + num_outputs)
    )

    out_t = pl.pallas_call(
        _mlp_kernel,
        out_shape=jax.ShapeDtypeStruct((num_outputs, Bp), jnp.float32),
        grid_spec=pltpu.PrefetchScalarGridSpec(
            num_scalar_prefetch=0,
            grid=grid,
            in_specs=[
                pl.BlockSpec((tile, Kp), lambda i: (i, 0)),      # x tile
                const_spec((num_hiddens, Kp)),                   # W1^T (padded)
                const_spec((num_hiddens, 1)),                    # b1^T
                const_spec((num_hiddens, num_hiddens)),          # W2^T
                const_spec((num_hiddens, 1)),                    # b2^T
                const_spec((num_hiddens, num_hiddens)),          # W3^T
                const_spec((num_hiddens, 1)),                    # b3^T
                const_spec((num_outputs, num_hiddens)),          # W4^T
                const_spec((num_outputs, 1)),                    # b4^T
            ],
            # Lane-dense output: batch on the lane axis -> unmasked stores.
            out_specs=pl.BlockSpec((num_outputs, tile), lambda i: (0, i)),
        ),
        compiler_params=pltpu.CompilerParams(
            dimension_semantics=("parallel",),
        ),
        cost_estimate=pl.CostEstimate(
            flops=flops,
            transcendentals=Bp * num_hiddens,   # tanh
            bytes_accessed=bytes_accessed,
        ),
    )(xp, w1t, b1t, w2t, b2t, w3t, b3t, w4t, b4t)

    # (num_outputs, Bp) -> (B, num_outputs); for num_outputs == 1 this is a
    # free reshape, not a real transpose.
    return jnp.transpose(out_t[:, :B])


# ----------------------------------------------------------------------------
# Params / reference
# ----------------------------------------------------------------------------
def init_params(key, num_inputs=114, num_hiddens=30, num_outputs=1):
    """Deterministic init mimicking nn.Linear (uniform +/- 1/sqrt(fan_in))."""
    ks = jax.random.split(key, 8)

    def lin(kw, kb, fan_in, fan_out):
        bound = 1.0 / jnp.sqrt(fan_in)
        W = jax.random.uniform(kw, (fan_in, fan_out), jnp.float32, -bound, bound)
        b = jax.random.uniform(kb, (1, fan_out), jnp.float32, -bound, bound)
        return W, b

    W1, b1 = lin(ks[0], ks[1], num_inputs, num_hiddens)
    W2, b2 = lin(ks[2], ks[3], num_hiddens, num_hiddens)
    W3, b3 = lin(ks[4], ks[5], num_hiddens, num_hiddens)
    W4, b4 = lin(ks[6], ks[7], num_hiddens, num_outputs)
    return dict(W1=W1, b1=b1, W2=W2, b2=b2, W3=W3, b3=b3, W4=W4, b4=b4)


def reference_forward(x, p):
    h = jnp.tanh(x @ p["W1"] + p["b1"])
    h = jnp.maximum(h @ p["W2"] + p["b2"], 0.0)
    h = jnp.maximum(h @ p["W3"] + p["b3"], 0.0)
    return h @ p["W4"] + p["b4"]


if __name__ == "__main__":
    key = jax.random.PRNGKey(0)
    kx, kp = jax.random.split(key)

    # Module defaults: batch_size=256, num_inputs=114, num_hiddens=30, num_outputs=1
    B, num_inputs, num_hiddens, num_outputs = 256, 114, 30, 1
    x = jax.random.normal(kx, (B, num_inputs), dtype=jnp.float32)
    params = init_params(kp, num_inputs, num_hiddens, num_outputs)

    out = jax.block_until_ready(ann_prediction_forward(x, params))
    ref = reference_forward(x, params)
    assert out.shape == (B, num_outputs)
    assert jnp.allclose(out, ref, atol=5e-5, rtol=5e-5)

    # Ragged batch exercises the pad-and-slice path.
    B2 = 200
    out2 = jax.block_until_ready(ann_prediction_forward(x[:B2], params))
    assert out2.shape == (B2, num_outputs)
    assert jnp.allclose(out2, ref[:B2], atol=5e-5, rtol=5e-5)

    # Explicit non-128-multiple tb is rounded up safely.
    out3 = jax.block_until_ready(ann_prediction_forward(x, params, tb=100))
    assert jnp.allclose(out3, ref, atol=5e-5, rtol=5e-5)

    print("KERNEL_OK")
</pallas_src>

<mosaic_0001>
module attributes {stable_mosaic.version = 11 : i64} {
  func.func @_k(%arg0: i32, %arg1: memref<8x128xf32, #tpu.memory_space<vmem>>, %arg2: memref<8x128xf32, #tpu.memory_space<vmem>>, %arg3: memref<8x128xf32, #tpu.memory_space<vmem>>) attributes {dimension_semantics = [#tpu.dimension_semantics<arbitrary>], iteration_bounds = array<i64: 2>, scalar_prefetch = 0 : i64, scratch_operands = 0 : i64, tpu.core_type = #tpu.core_type<tc>, window_params = [{transform_indices = @transform_0, window_bounds = array<i64: 8, 128>}, {pipeline_mode = #tpu.pipeline_mode<synchronous>, transform_indices = @transform_1, window_bounds = array<i64: 8, 128>}, {transform_indices = @transform_2, window_bounds = array<i64: 8, 128>}]} {
    %c0 = arith.constant 0 : index
    %c0_0 = arith.constant 0 : index
    %0 = vector.load %arg1[%c0, %c0_0] : memref<8x128xf32, #tpu.memory_space<vmem>>, vector<8x128xf32>
    %c0_1 = arith.constant 0 : index
    %c0_2 = arith.constant 0 : index
    %1 = vector.load %arg2[%c0_1, %c0_2] : memref<8x128xf32, #tpu.memory_space<vmem>>, vector<8x128xf32>
    %2 = arith.addf %0, %1 : vector<8x128xf32>
    %c0_3 = arith.constant 0 : index
    %c0_4 = arith.constant 0 : index
    %3 = vector.load %arg3[%c0_3, %c0_4] : memref<8x128xf32, #tpu.memory_space<vmem>>, vector<8x128xf32>
    tpu.vector_store %arg3[%c0_3, %c0_4], %2 {strides = array<i32>} : memref<8x128xf32, #tpu.memory_space<vmem>>, vector<8x128xf32>,
    return
  }
  func.func @transform_0(%arg0: i32) -> (i32, i32) {
    %c0_i32 = arith.constant 0 : i32
    %c0_i32_0 = arith.constant 0 : i32
    return %arg0, %c0_i32 : i32, i32
  }
  func.func @transform_1(%arg0: i32) -> (i32, i32) {
    %c0_i32 = arith.constant 0 : i32
    %c0_i32_0 = arith.constant 0 : i32
    %c0_i32_1 = arith.constant 0 : i32
    return %c0_i32, %c0_i32_0 : i32, i32
  }
  func.func @transform_2(%arg0: i32) -> (i32, i32) {
    %c0_i32 = arith.constant 0 : i32
    %c0_i32_0 = arith.constant 0 : i32
    return %arg0, %c0_i32 : i32, i32
  }
}

module attributes {stable_mosaic.version = 11 : i64} {
  func.func @_mlp_kernel(%arg0: i32, %arg1: memref<256x128xf32, #tpu.memory_space<vmem>>, %arg2: memref<30x128xf32, #tpu.memory_space<vmem>>, %arg3: memref<30x1xf32, #tpu.memory_space<vmem>>, %arg4: memref<30x30xf32, #tpu.memory_space<vmem>>, %arg5: memref<30x1xf32, #tpu.memory_space<vmem>>, %arg6: memref<30x30xf32, #tpu.memory_space<vmem>>, %arg7: memref<30x1xf32, #tpu.memory_space<vmem>>, %arg8: memref<1x30xf32, #tpu.memory_space<vmem>>, %arg9: memref<1x1xf32, #tpu.memory_space<vmem>>, %arg10: memref<1x256xf32, #tpu.memory_space<vmem>>) attributes {dimension_semantics = [#tpu.dimension_semantics<parallel>], iteration_bounds = array<i64: 1>, scalar_prefetch = 0 : i64, scratch_operands = 0 : i64, tpu.core_type = #tpu.core_type<tc>, window_params = [{transform_indices = @transform_0, window_bounds = array<i64: 256, 128>}, {pipeline_mode = #tpu.pipeline_mode<synchronous>, transform_indices = @transform_1, window_bounds = array<i64: 30, 128>}, {pipeline_mode = #tpu.pipeline_mode<synchronous>, transform_indices = @transform_2, window_bounds = array<i64: 30, 1>}, {pipeline_mode = #tpu.pipeline_mode<synchronous>, transform_indices = @transform_3, window_bounds = array<i64: 30, 30>}, {pipeline_mode = #tpu.pipeline_mode<synchronous>, transform_indices = @transform_4, window_bounds = array<i64: 30, 1>}, {pipeline_mode = #tpu.pipeline_mode<synchronous>, transform_indices = @transform_5, window_bounds = array<i64: 30, 30>}, {pipeline_mode = #tpu.pipeline_mode<synchronous>, transform_indices = @transform_6, window_bounds = array<i64: 30, 1>}, {pipeline_mode = #tpu.pipeline_mode<synchronous>, transform_indices = @transform_7, window_bounds = array<i64: 1, 30>}, {pipeline_mode = #tpu.pipeline_mode<synchronous>, transform_indices = @transform_8, window_bounds = array<i64: 1, 1>}, {transform_indices = @transform_9, window_bounds = array<i64: 1, 256>}]} {
    %c0 = arith.constant 0 : index
    %c0_0 = arith.constant 0 : index
    %0 = vector.load %arg2[%c0, %c0_0] : memref<30x128xf32, #tpu.memory_space<vmem>>, vector<30x128xf32>
    %c0_1 = arith.constant 0 : index
    %c0_2 = arith.constant 0 : index
    %1 = vector.load %arg1[%c0_1, %c0_2] : memref<256x128xf32, #tpu.memory_space<vmem>>, vector<256x128xf32>
    %cst = arith.constant dense<0.000000e+00> : vector<30x256xf32>
    %2 = tpu.matmul %0, %1, %cst {dimension_numbers = #tpu.dot_dimension_numbers<[1], [1], [0], [0], [0, 0, 1, 0], [], []>} : vector<30x128xf32>, vector<256x128xf32>, vector<30x256xf32> -> vector<30x256xf32>
    %c0_3 = arith.constant 0 : index
    %c0_4 = arith.constant 0 : index
    %3 = vector.load %arg3[%c0_3, %c0_4] : memref<30x1xf32, #tpu.memory_space<vmem>>, vector<30x1xf32>
    %4 = vector.broadcast %3 : vector<30x1xf32> to vector<30x256xf32>
    %5 = arith.addf %2, %4 : vector<30x256xf32>
    %6 = math.tanh %5 : vector<30x256xf32>
    %c0_5 = arith.constant 0 : index
    %c0_6 = arith.constant 0 : index
    %7 = vector.load %arg4[%c0_5, %c0_6] : memref<30x30xf32, #tpu.memory_space<vmem>>, vector<30x30xf32>
    %cst_7 = arith.constant dense<0.000000e+00> : vector<30x256xf32>
    %8 = tpu.matmul %7, %6, %cst_7 {dimension_numbers = #tpu.dot_dimension_numbers<[1], [0], [0], [1], [0, 0, 1, 1], [], []>} : vector<30x30xf32>, vector<30x256xf32>, vector<30x256xf32> -> vector<30x256xf32>
    %c0_8 = arith.constant 0 : index
    %c0_9 = arith.constant 0 : index
    %9 = vector.load %arg5[%c0_8, %c0_9] : memref<30x1xf32, #tpu.memory_space<vmem>>, vector<30x1xf32>
    %10 = vector.broadcast %9 : vector<30x1xf32> to vector<30x256xf32>
    %11 = arith.addf %8, %10 : vector<30x256xf32>
    %cst_10 = arith.constant 0.000000e+00 : f32
    %12 = vector.broadcast %cst_10 : f32 to vector<30x256xf32>
    %13 = arith.maximumf %11, %12 : vector<30x256xf32>
    %c0_11 = arith.constant 0 : index
    %c0_12 = arith.constant 0 : index
    %14 = vector.load %arg6[%c0_11, %c0_12] : memref<30x30xf32, #tpu.memory_space<vmem>>, vector<30x30xf32>
    %cst_13 = arith.constant dense<0.000000e+00> : vector<30x256xf32>
    %15 = tpu.matmul %14, %13, %cst_13 {dimension_numbers = #tpu.dot_dimension_numbers<[1], [0], [0], [1], [0, 0, 1, 1], [], []>} : vector<30x30xf32>, vector<30x256xf32>, vector<30x256xf32> -> vector<30x256xf32>
    %c0_14 = arith.constant 0 : index
    %c0_15 = arith.constant 0 : index
    %16 = vector.load %arg7[%c0_14, %c0_15] : memref<30x1xf32, #tpu.memory_space<vmem>>, vector<30x1xf32>
    %17 = vector.broadcast %16 : vector<30x1xf32> to vector<30x256xf32>
    %18 = arith.addf %15, %17 : vector<30x256xf32>
    %cst_16 = arith.constant 0.000000e+00 : f32
    %19 = vector.broadcast %cst_16 : f32 to vector<30x256xf32>
    %20 = arith.maximumf %18, %19 : vector<30x256xf32>
    %c0_17 = arith.constant 0 : index
    %c0_18 = arith.constant 0 : index
    %21 = vector.load %arg8[%c0_17, %c0_18] : memref<1x30xf32, #tpu.memory_space<vmem>>, vector<1x30xf32>
    %cst_19 = arith.constant dense<0.000000e+00> : vector<1x256xf32>
    %22 = tpu.matmul %21, %20, %cst_19 {dimension_numbers = #tpu.dot_dimension_numbers<[1], [0], [0], [1], [0, 0, 1, 1], [], []>} : vector<1x30xf32>, vector<30x256xf32>, vector<1x256xf32> -> vector<1x256xf32>
    %c0_20 = arith.constant 0 : index
    %c0_21 = arith.constant 0 : index
    %23 = vector.load %arg9[%c0_20, %c0_21] : memref<1x1xf32, #tpu.memory_space<vmem>>, vector<1x1xf32>
    %24 = vector.broadcast %23 : vector<1x1xf32> to vector<1x256xf32>
    %25 = arith.addf %22, %24 : vector<1x256xf32>
    %c0_22 = arith.constant 0 : index
    %c0_23 = arith.constant 0 : index
    %26 = vector.load %arg10[%c0_22, %c0_23] : memref<1x256xf32, #tpu.memory_space<vmem>>, vector<1x256xf32>
    tpu.vector_store %arg10[%c0_22, %c0_23], %25 {strides = array<i32>} : memref<1x256xf32, #tpu.memory_space<vmem>>, vector<1x256xf32>,
    return
  }
  func.func @transform_0(%arg0: i32) -> (i32, i32) {
    %c0_i32 = arith.constant 0 : i32
    %c0_i32_0 = arith.constant 0 : i32
    return %arg0, %c0_i32 : i32, i32
  }
  func.func @transform_1(%arg0: i32) -> (i32, i32) {
    %c0_i32 = arith.constant 0 : i32
    %c0_i32_0 = arith.constant 0 : i32
    %c0_i32_1 = arith.constant 0 : i32
    return %c0_i32, %c0_i32_0 : i32, i32
  }
  func.func @transform_2(%arg0: i32) -> (i32, i32) {
    %c0_i32 = arith.constant 0 : i32
    %c0_i32_0 = arith.constant 0 : i32
    %c0_i32_1 = arith.constant 0 : i32
    return %c0_i32, %c0_i32_0 : i32, i32
  }
  func.func @transform_3(%arg0: i32) -> (i32, i32) {
    %c0_i32 = arith.constant 0 : i32
    %c0_i32_0 = arith.constant 0 : i32
    %c0_i32_1 = arith.constant 0 : i32
    return %c0_i32, %c0_i32_0 : i32, i32
  }
  func.func @transform_4(%arg0: i32) -> (i32, i32) {
    %c0_i32 = arith.constant 0 : i32
    %c0_i32_0 = arith.constant 0 : i32
    %c0_i32_1 = arith.constant 0 : i32
    return %c0_i32, %c0_i32_0 : i32, i32
  }
  func.func @transform_5(%arg0: i32) -> (i32, i32) {
    %c0_i32 = arith.constant 0 : i32
    %c0_i32_0 = arith.constant 0 : i32
    %c0_i32_1 = arith.constant 0 : i32
    return %c0_i32, %c0_i32_0 : i32, i32
  }
  func.func @transform_6(%arg0: i32) -> (i32, i32) {
    %c0_i32 = arith.constant 0 : i32
    %c0_i32_0 = arith.constant 0 : i32
    %c0_i32_1 = arith.constant 0 : i32
    return %c0_i32, %c0_i32_0 : i32, i32
  }
  func.func @transform_7(%arg0: i32) -> (i32, i32) {
    %c0_i32 = arith.constant 0 : i32
    %c0_i32_0 = arith.constant 0 : i32
    %c0_i32_1 = arith.constant 0 : i32
    return %c0_i32, %c0_i32_0 : i32, i32
  }
  func.func @transform_8(%arg0: i32) -> (i32, i32) {
    %c0_i32 = arith.constant 0 : i32
    %c0_i32_0 = arith.constant 0 : i32
    %c0_i32_1 = arith.constant 0 : i32
    return %c0_i32, %c0_i32_0 : i32, i32
  }
  func.func @transform_9(%arg0: i32) -> (i32, i32) {
    %c0_i32 = arith.constant 0 : i32
    %c0_i32_0 = arith.constant 0 : i32
    return %c0_i32, %arg0 : i32, i32
  }
}

</mosaic_0001>

<bundles_post_ra>
// kernel: tpu_custom_call.1
= control target key start
LH: loop header
LB: loop body
LE: loop exit
PB: predicated region body
PF: predicated region fallthrough
CT: control target
= control target key end

     0   :  { %7 = vsyncpa [#allocation3], 0  ;;  %s690_s0 = inlined_call_operand.hbm [shape: f32[16,128], index: 0, kind: input, shape index: {}]   ;;  %s691_s1 = inlined_call_operand.hbm [shape: f32[8,128], index: 1, kind: input, shape index: {}]   ;;  %s692_s2 = inlined_call_operand.hbm [shape: f32[16,128], index: 2, kind: output, shape index: {}]  }
   0x1   :  { %9 = vsyncpa [#allocation3 + $0x1], 0 }
   0x2   :  { %10 = vsyncpa [#allocation6], 0 }
   0x3   :  { %11 = vsyncpa [#allocation4], 0 }
   0x4   :  { %13 = vsyncpa [#allocation4 + $0x1], 0  ;;  %s489_s9 = smov 0   ;;  %s491_s10 = smov 0  }
   0x5   :  { %s493_s11 = smov 0   ;;  %s495_s12 = smov 0  }
   0x6 LB: > { %s510_s13 = sadd.s32 4294967295, %s469_s12   ;;  %s270_s14 = sadd.s32 4294967294, %s469_s12   ;;  %s469_s12 = sphi %s495_s12, %s716_s12   ;;  %s465_s11 = sphi %s493_s11, %s715_s11   ;;  %s461_s10 = sphi %s491_s10, %s714_s10   ;;  %s457_s9 = sphi %s489_s9, %s713_s9  }
   0x7   : > { %p39_p0 = scmp.ne.s32.totalorder %s461_s10, %s457_s9  ;;  %p693_p1 = scmp.eq.s32.totalorder %s510_s13, 0 }
   0x8   : > { %p90_p3 = scmp.eq.s32.totalorder %s270_s14, 1  ;;  %p271_p5 = scmp.ge.s32.totalorder %s469_s12, 1 }
   0x9   : > { %p519_p4 = por %p693_p1, %p39_p0  ;;  %p97_p7 = scmp.lt.s32.totalorder %s469_s12, 3 }
   0xa   : > { %p524_p6 = por %p90_p3, %p39_p0  ;;  %s471_s18 = smov [#allocation5]  }
   0xb   : > { %s696_s15 = scalar_select %p519_p4, 1, 0 }
   0xc   : > { %s697_s16 = scalar_select %p524_p6, 1, 0 }
   0xd   : > { %p529_p8 = pnand %p271_p5, %p97_p7  ;;  %s110_s19 = sshll.u32 %s471_s18, 4  ;;  %s111_s19 = int_to_ptr.vmem [resolvable:$true] %s110_s19 }
   0xe   : > { %s537_s20 = sadd.s32 1, %s469_s12   ;;  %s26_s24 = sadd.s32 1, %s465_s11 }
   0xf   : > { %s698_s17 = scalar_select %p529_p8, 1, 0 }
  0x10   : > { %p292_p10 = pneg %p529_p8  ;;  %s23_s22 = ssub.s32 %s469_s12, %s537_s20 }
  0x11   : > { %p547_p12 = scmp.eq.s32.totalorder %s23_s22, 0  ;;  %s341_s27 = scalar_lea.hbm %s691_s1, 128 }
  0x12   : > { %p541_p11 = pnand %p292_p10, %p693_p1  ;;  %p342_p0 = scmp.ne.s32.totalorder %s691_s1, %s341_s27 }
  0x13   : > { %s700_s23 = scalar_select %p547_p12, 1, 0 }
  0x14   : > { %p343_p3 = pneg %p541_p11  ;;  %p348_p10 = scmp.lt.u32.totalorder %s341_s27, %s691_s1 }
  0x16   : > { %p344_p5 = pnand %p343_p3, %p342_p0 }
  0x18   : > { %p345_p7 = pneg %p344_p5 }
  0x1a   : > { %p350_p9 = pnand %p348_p10, %p345_p7 }
  0x1c   : > { %353 = shalt.err (!%p350_p9)
}
  0x1d   : > { %s354_s4 = scalar_lea.vmem %s111_s19, 128  ;;  %p362_p6 = scmp.lt.s32.totalorder %s111_s19, %s111_s19 }
  0x1e   : > { %p355_p1 = scmp.ne.s32.totalorder %s111_s19, %s354_s4  ;;  %p363_p4 = scmp.lt.s32.totalorder %s354_s4, %s354_s4 }
  0x20   : > { %p357_p2 = pnand %p355_p1, %p343_p3  ;;  %p364_p8 = por %p363_p4, %p362_p6 }
  0x22   : > { %p358_p13 = pneg %p357_p2 }
  0x24   : > { %p365_p12 = pnand %p364_p8, %p358_p13 }
  0x26   : > { %368 = shalt.err (!%p365_p12)
}
  0x27   : > { %295 = dma.hbm_to_vmem [thread:$0]  (!%p541_p11), %s691_s1, 128, %s111_s19, [#allocation6]  }
  0x28   : > { %p701_p1 = scmp.ne.s32.totalorder %s700_s23, 0  ;;  %p34_p2 = scmp.eq.s32.totalorder %s469_s12, 0 }
  0x29   : > { %p702_p4 = scmp.ne.s32.totalorder %s465_s11, %s461_s10  ;;  %p703_p6 = scmp.eq.s32.totalorder %s510_s13, 1 }
  0x2a   : > { %s573_s7 = scalar_select %p701_p1, %s465_s11, %s26_s24  }
  0x2b   : > { %p581_p8 = por %p703_p6, %p702_p4  ;;  %p305_p9 = scmp.lt.s32.totalorder %s469_s12, 2 }
  0x2c   : > { %s121_s14 = sand.u32 1, %s465_s11   ;;  %p705_p12 = pmov %p702_p4 }
  0x2d   : > { %s274_s18 = sshll.u32 %s121_s14, 3  ;;  %s275_s21 = sshll.u32 %s469_s12, 7 }
  0x2e   : > { %p35_p13 = por %p34_p2, %p705_p12  ;;  %s594_s19 = scalar_lea.hbm %s690_s0, %s275_s21 }
  0x2f   : > { %s125_s23 = scalar_lea.vmem [#allocation2], %s274_s18  ;;  %s122_s27 = scalar_lea.sflag [#allocation3], %s121_s14 }
  0x30   : > { %s132_s24 = sshll.u32 %s125_s23, 4  ;;  %p596_p11 = pnand %p305_p9, %p35_p13  ;;  %s600_s24 = int_to_ptr.vmem [resolvable:$true] %s132_s24 }
  0x31   : > { %s369_s28 = scalar_lea.hbm %s594_s19, 128  ;;  %s374_s3 = scalar_lea.hbm %s690_s0, 256 }
  0x32   : > { %p370_p0 = scmp.ne.s32.totalorder %s594_s19, %s369_s28  ;;  %p371_p3 = pneg %p596_p11 }
  0x33   : > { %p375_p10 = scmp.lt.u32.totalorder %s594_s19, %s690_s0  ;;  %p376_p1 = scmp.lt.u32.totalorder %s374_s3, %s369_s28 }
  0x34   : > { %p372_p5 = pnand %p371_p3, %p370_p0  ;;  %p378_p4 = scmp.lt.u32.totalorder %s369_s28, %s594_s19 }
  0x35   : > { %p377_p2 = por %p376_p1, %p375_p10 }
  0x36   : > { %p373_p7 = pneg %p372_p5 }
  0x37   : > { %p379_p6 = por %p378_p4, %p377_p2 }
  0x39   : > { %p380_p9 = pnand %p379_p6, %p373_p7 }
  0x3b   : > { %383 = shalt.err (!%p380_p9)
}
  0x3c   : > { %s384_s6 = scalar_lea.vmem %s600_s24, 128  ;;  %s472_s14 = smov [#allocation2]  }
  0x3d   : > { %p385_p12 = scmp.ne.s32.totalorder %s600_s24, %s384_s6  ;;  %s389_s18 = sshll.u32 %s472_s14, 4  ;;  %s390_s18 = int_to_ptr.vmem [resolvable:$false] %s389_s18 }
  0x3e   : > { %s391_s21 = scalar_lea.vmem %s390_s18, 256  ;;  %p392_p5 = scmp.lt.s32.totalorder %s600_s24, %s390_s18 }
  0x3f   : > { %p387_p13 = pnand %p385_p12, %p371_p3  ;;  %p393_p10 = scmp.lt.s32.totalorder %s391_s21, %s384_s6 }
  0x41   : > { %p388_p0 = pneg %p387_p13  ;;  %p394_p1 = por %p393_p10, %p392_p5 }
  0x43   : > { %p395_p2 = pnand %p394_p1, %p388_p0 }
  0x45   : > { %398 = shalt.err (!%p395_p2)
}
  0x46   : > { %299 = dma.hbm_to_vmem [thread:$0]  (!%p596_p11), %s594_s19, 128, %s600_s24, %s122_s27  }
  0x47   : > { %p707_p7 = scmp.ne.s32.totalorder %s698_s17, 0 }
  0x48   : > { %s630_s22 = sand.u32 (!%p707_p7), 1, %s461_s10   ;;  %p708_p3 = scmp.ne.s32.totalorder (!%p707_p7), %s696_s15, 0 }
  0x49   : > { %141 = sbr.rel (%p707_p7) target bundleno = 109 (0x6d), region = 28  ;;  %s277_s25 = sshll.u32 (!%p707_p7), %s630_s22, 3 }
  0x4a   : > { %s144_s23 = scalar_lea.sflag (!%p707_p7), [#allocation3], %s630_s22  ;;  %s147_s28 = scalar_lea.vmem (!%p707_p7), [#allocation2], %s277_s25 }
  0x50   : > { %444 = dma.done.wait (%p708_p3), %s144_s23, 128  }
  0x51   : > { %446 = vsyncadd (%p708_p3), %s144_s23, 4294967168  ;;  %p709_p4 = scmp.eq.s32.totalorder %s510_s13, 0 }
  0x53   : > { %448 = dma.done.wait (%p709_p4), [#allocation6], 128   ;;  %p710_p11 = pmov %p709_p4 }
  0x54   : > { %s171_s17 = scalar_lea.vmem [#allocation7], %s277_s25  ;;  %s281_s24 = sshll.u32 %s510_s13, 7  ;;  %v172_v0 = vld [vmem:[%s147_s28] sm:$0xff]  ;;  %v173_v1 = vld [vmem:[#allocation5] sm:$0xff] }
  0x55   : > { %450 = vsyncadd (%p710_p11), [#allocation6], 4294967168  ;;  %s190_s19 = sshll.u32 %s171_s17, 4  ;;  %v174_v2 = vadd.f32 %v173_v1, %v172_v0  ;;  %s648_s27 = scalar_lea.hbm %s692_s2, %s281_s24  ;;  %s643_s19 = int_to_ptr.vmem [resolvable:$true] %s190_s19 }
  0x56   : > { %s177_s29 = scalar_lea.sflag [#allocation4], %s630_s22  ;;  %s399_s30 = scalar_lea.vmem %s643_s19, 128 }
  0x57   : > { %175 = vst [vmem:[%s171_s17] sm:$0xff] %v174_v2  ;;  %p400_p6 = scmp.ne.s32.totalorder %s643_s19, %s399_s30  ;;  %s473_s13 = smov [#allocation7]  }
  0x58   : > { %s403_s3 = sshll.u32 %s473_s13, 4  ;;  %s404_s3 = int_to_ptr.vmem [resolvable:$false] %s403_s3 }
  0x59   : > { %p401_p9 = pnand %p400_p6, %p581_p8  ;;  %s405_s4 = scalar_lea.vmem %s404_s3, 256 }
  0x5a   : > { %p406_p13 = scmp.lt.s32.totalorder %s643_s19, %s404_s3  ;;  %p407_p0 = scmp.lt.s32.totalorder %s405_s4, %s399_s30 }
  0x5b   : > { %p402_p12 = pneg %p401_p9 }
  0x5c   : > { %p408_p5 = por %p407_p0, %p406_p13 }
  0x5e   : > { %p409_p10 = pnand %p408_p5, %p402_p12 }
  0x60   : > { %412 = shalt.err (!%p409_p10)
}
  0x61   : > { %s413_s5 = scalar_lea.hbm %s648_s27, 128  ;;  %s417_s18 = scalar_lea.hbm %s692_s2, 256 }
  0x62   : > { %p414_p1 = scmp.ne.s32.totalorder %s648_s27, %s413_s5  ;;  %p418_p3 = scmp.lt.u32.totalorder %s648_s27, %s692_s2 }
  0x63   : > { %p419_p4 = scmp.lt.u32.totalorder %s417_s18, %s413_s5  ;;  %p421_p6 = scmp.lt.u32.totalorder %s413_s5, %s648_s27 }
  0x64   : > { %p415_p2 = pnand %p414_p1, %p581_p8 }
  0x65   : > { %p420_p11 = por %p419_p4, %p418_p3 }
  0x66   : > { %p416_p7 = pneg %p415_p2 }
  0x67   : > { %p422_p9 = por %p421_p6, %p420_p11 }
  0x69   : > { %p423_p12 = pnand %p422_p9, %p416_p7 }
  0x6b   : > { %426 = shalt.err (!%p423_p12)
}
  0x6c   : > { %290 = dma.vmem_to_hbm [thread:$0]  (%p581_p8), %s643_s19, 128, %s648_s27, %s177_s29  }
  0x6d PF: > { %s202_s25 = sand.u32 1, %s457_s9   ;;  %p711_p13 = scmp.ne.s32.totalorder %s697_s16, 0 }
  0x6e   : > { %p712_p0 = scmp.ge.s32.totalorder %s469_s12, 2  ;;  %s203_s23 = scalar_lea.sflag [#allocation4], %s202_s25 }
  0x70   : > { %p301_p5 = pnand %p712_p0, %p711_p13 }
  0x72   : > { %452 = dma.done.wait (!%p301_p5), %s203_s23, 128  }
  0x73   : > { %454 = vsyncadd (!%p301_p5), %s203_s23, 4294967168  ;;  %p16_p10 = scmp.ge.s32.totalorder %s537_s20, 4   ;;  %s713_s9 = smov %s461_s10 }
  0x74   : > { %s714_s10 = smov %s465_s11  ;;  %s715_s11 = smov %s573_s7 }
  0x75   : > { %s716_s12 = smov %s537_s20  ;;  %18 = sbr.rel (!%p16_p10) target bundleno = 6 (0x6), region = 77 }
  0x7c   :  { %208 = vsyncpa [#allocation3], 1 }
  0x7d   :  { %210 = vsyncpa [#allocation3 + $0x1], 1 }
  0x7e   :  { %211 = vsyncpa [#allocation6], 1 }
  0x7f   :  { %212 = vsyncpa [#allocation4], 1 }
  0x80   :  { %214 = vsyncpa [#allocation4 + $0x1], 1 }

// kernel: tpu_custom_call.1
= control target key start
LH: loop header
LB: loop body
LE: loop exit
PB: predicated region body
PF: predicated region fallthrough
CT: control target
= control target key end

     0   :  { %s1012_s0 = inlined_call_operand.hbm [shape: f32[256,128], index: 0, kind: input, shape index: {}]   ;;  %s1013_s1 = inlined_call_operand.vmem [shape: f32[30,128], index: 1, kind: input, shape index: {}]   ;;  %s1014_s2 = inlined_call_operand.vmem [shape: f32[30,1], index: 2, kind: input, shape index: {}]   ;;  %s1015_s3 = inlined_call_operand.vmem [shape: f32[30,30], index: 3, kind: input, shape index: {}]   ;;  %s1016_s4 = inlined_call_operand.vmem [shape: f32[30,1], index: 4, kind: input, shape index: {}]   ;;  %s1017_s5 = inlined_call_operand.vmem [shape: f32[30,30], index: 5, kind: input, shape index: {}]   ;;  %s1018_s6 = inlined_call_operand.vmem [shape: f32[30,1], index: 6, kind: input, shape index: {}]   ;;  %s1019_s7 = inlined_call_operand.vmem [shape: f32[1,30], index: 7, kind: input, shape index: {}]   ;;  %s1020_s8 = inlined_call_operand.<no memory space> [shape: f32[1,1], index: 8, kind: input, shape index: {}]   ;;  %s1021_s9 = inlined_call_operand.hbm [shape: f32[1,256], index: 9, kind: output, shape index: {}]  }
   0x1   :  { %v14_v0 = vstv %s1020_s8 }
   0x2   :  { %15 = vst [vmem:[#allocation2] sm:$0x1] %v14_v0 }
   0x3   :  { %16 = vsyncpa [#allocation4], 0 }
   0x4   :  { %17 = vsyncpa [#allocation5], 0  ;;  %s814_s11 = smov [#allocation3]   ;;  %s766_s15 = scalar_lea.hbm %s1012_s0, 4096 }
   0x5   :  { %s23_s12 = sshll.u32 %s814_s11, 4  ;;  %p767_p0 = scmp.ne.s32.totalorder %s1012_s0, %s766_s15  ;;  %s24_s12 = int_to_ptr.vmem [resolvable:$true] %s23_s12 }
   0x6   :  { %p770_p1 = scmp.lt.u32.totalorder %s766_s15, %s1012_s0 }
   0x8   :  { %p772_p2 = pnand %p770_p1, %p767_p0 }
   0xa   :  { %775 = shalt.err (!%p772_p2)
}
   0xb   :  { %s776_s8 = scalar_lea.vmem %s24_s12, 4096  ;;  %p781_p4 = scmp.lt.s32.totalorder %s24_s12, %s24_s12 }
   0xc   :  { %p777_p3 = scmp.ne.s32.totalorder %s24_s12, %s776_s8  ;;  %p782_p5 = scmp.lt.s32.totalorder %s776_s8, %s776_s8 }
   0xe   :  { %p783_p6 = por %p782_p5, %p781_p4 }
  0x10   :  { %p784_p7 = pnand %p783_p6, %p777_p3 }
  0x12   :  { %787 = shalt.err (!%p784_p7)
}
  0x13   :  { %s815_s20 = smov 128   ;;  %s816_s21 = smov 8  }
  0x14   :  { %29 = dma.hbm_to_vmem [thread:$0]  %s1012_s0, 4096, %s24_s12, [#allocation4], %s815_s20, %s815_s20, %s816_s21  }
  0x15   :  { %810 = dma.done.wait [#allocation4], 4096  }
  0x16   :  { %811 = vsyncadd [#allocation4], 4294963200  ;;  %v817_v1 = vmov 0   ;;  %v69_v2 = vld [vmem:[#allocation3 + $0x80] sm:$0xff]  ;;  %v70_v3 = vld [vmem:[#allocation3 + $0x88] sm:$0xff]  ;;  %vm247_vm0 = vcmask 1045504  }
  0x17   :  { %748 = vset.pattern.permute.xlu0 %v817_v1  ;;  %749 = vset.pattern.permute.xlu1 %v817_v1  ;;  %v53_v4 = vld [vmem:[#allocation3] sm:$0xff]  ;;  %v678_v5 = vpack.c.bf16 %v70_v3, %v69_v2  ;;  %v54_v6 = vld [vmem:[#allocation3 + $0x8] sm:$0xff]  ;;  %v71_v7 = vld [vmem:[#allocation3 + $0x90] sm:$0xff]  ;;  %v818_v3 = vmov 0.0   ;;  %vm819_vm1 = vmmov 1   ;;  %vm234_vm3 = vcmask 244736  }
  0x18   :  { %v72_v8 = vld [vmem:[#allocation3 + $0x98] sm:$0xff]  ;;  %v680_v9 = vpack.c.bf16 %v54_v6, %v53_v4  ;;  %v55_v11 = vld [vmem:[#allocation3 + $0x10] sm:$0xff]  ;;  %v73_v13 = vld [vmem:[#allocation3 + $0xa0] sm:$0xff]  ;;  %318 = vmatprep.mubr.f32.mxu1 %v818_v3  ;;  %s821_s21 = smov [#allocation6]  }
  0x19   :  { %v682_v10 = vpack.c.bf16 %v72_v8, %v71_v7  ;;  %679 = vmatprep.subr.bf16.mxu0 %v678_v5  ;;  %v56_v12 = vld [vmem:[#allocation3 + $0x18] sm:$0xff]  ;;  %v74_v14 = vld [vmem:[#allocation3 + $0xa8] sm:$0xff]  ;;  %v57_v20 = vld [vmem:[#allocation3 + $0x20] sm:$0xff] }
  0x1a   :  { %681 = vmatpush3.bf16.xpose.msra.mxu0 %v680_v9  ;;  %v684_v15 = vpack.c.bf16 %v56_v12, %v55_v11  ;;  %v686_v16 = vpack.c.bf16 %v74_v14, %v73_v13  ;;  %v890_v17 = vld [vmem:[%s1013_s1] sm:$0xff]  ;;  %v87_v19 = vld [vmem:[%s1014_s2 + $0x10] sm:$0xff]  ;;  %v86_v24 = vld [vmem:[%s1014_s2 + $0x8] sm:$0xff] }
  0x1b   :  { %683 = vmatprep.subr.bf16.mxu0 %v682_v10  ;;  %670 = vmatprep.mubr.f32.mxu0 %v890_v17  ;;  %v85_v18 = vld [vmem:[%s1014_s2] sm:$0xff]  ;;  %v58_v21 = vld [vmem:[#allocation3 + $0x28] sm:$0xff]  ;;  %v75_v22 = vld [vmem:[#allocation3 + $0xb0] sm:$0xff] }
  0x1c   :  { %91 = vperm.xlu0 %748, %v85_v18   ;;  %v76_v23 = vld [vmem:[#allocation3 + $0xb8] sm:$0xff]  ;;  %101 = vperm.xlu1 %749, %v87_v19   ;;  %v688_v26 = vpack.c.bf16 %v58_v21, %v57_v20  ;;  %v211_v29 = vld [vmem:[%s1016_s4 + $0x8] sm:$0xff]  ;;  %v59_v30 = vld [vmem:[#allocation3 + $0x30] sm:$0xff] }
  0x1d   :  { %v88_v25 = vld [vmem:[%s1014_s2 + $0x18] sm:$0x3f]  ;;  %v690_v27 = vpack.c.bf16 %v76_v23, %v75_v22  ;;  %v210_v28 = vld [vmem:[%s1016_s4] sm:$0xff]  ;;  %v78_v33 = vld [vmem:[#allocation3 + $0xc8] sm:$0xff] }
  0x1e   :  { %v60_v31 = vld [vmem:[#allocation3 + $0x38] sm:$0xff]  ;;  %v77_v32 = vld [vmem:[#allocation3 + $0xc0] sm:$0xff]  ;;  %v212_v34 = vld [vmem:[%s1016_s4 + $0x10] sm:$0xff] }
  0x1f   :  { %v213_v35 = vld [vmem:[%s1016_s4 + $0x18] sm:$0x3f]  ;;  %v692_v36 = vpack.c.bf16 %v60_v31, %v59_v30  ;;  %v694_v37 = vpack.c.bf16 %v78_v33, %v77_v32  ;;  %v355_v38 = vld [vmem:[%s1018_s6] sm:$0xff]  ;;  %v356_v39 = vld [vmem:[%s1018_s6 + $0x8] sm:$0xff]  ;;  %s614_s4 = sshll.u32 %s821_s21, 4  ;;  %s615_s4 = int_to_ptr.vmem [resolvable:$true] %s614_s4 }
  0x20   :  { %96 = vperm.xlu0 %748, %v86_v24   ;;  %106 = vperm.xlu1 %749, %v88_v25   ;;  %v61_v40 = vld [vmem:[#allocation3 + $0x40] sm:$0xff]  ;;  %v62_v41 = vld [vmem:[#allocation3 + $0x48] sm:$0xff]  ;;  %v79_v42 = vld [vmem:[#allocation3 + $0xd0] sm:$0xff]  ;;  %p793_p9 = scmp.lt.s32.totalorder %s615_s4, %s615_s4 }
  0x21   :  { %v80_v43 = vld [vmem:[#allocation3 + $0xd8] sm:$0xff]  ;;  %v357_v44 = vld [vmem:[%s1018_s6 + $0x10] sm:$0xff]  ;;  %v696_v46 = vpack.c.bf16 %v62_v41, %v61_v40  ;;  %v81_v51 = vld [vmem:[#allocation3 + $0xe0] sm:$0xff] }
  0x22   :  { %685 = vmatpush3.bf16.xpose.msra.mxu0 %v684_v15  ;;  %v358_v45 = vld [vmem:[%s1018_s6 + $0x18] sm:$0x3f]  ;;  %v698_v47 = vpack.c.bf16 %v80_v43, %v79_v42  ;;  %v495_v48 = vld [vmem:[#allocation2] sm:$0x1]  ;;  %v82_v52 = vld [vmem:[#allocation3 + $0xe8] sm:$0xff] }
  0x23   :  { %687 = vmatprep.subr.bf16.mxu0 %v686_v16  ;;  %v63_v49 = vld [vmem:[#allocation3 + $0x50] sm:$0xff]  ;;  %v64_v50 = vld [vmem:[#allocation3 + $0x58] sm:$0xff]  ;;  %v702_v54 = vpack.c.bf16 %v82_v52, %v81_v51  ;;  %v65_v55 = vld [vmem:[#allocation3 + $0x60] sm:$0xff] }
  0x24   :  { %216 = vperm.xlu0 %748, %v210_v28   ;;  %221 = vperm.xlu1 %749, %v211_v29   ;;  %v700_v53 = vpack.c.bf16 %v64_v50, %v63_v49  ;;  %v66_v56 = vld [vmem:[#allocation3 + $0x68] sm:$0xff]  ;;  %v83_v57 = vld [vmem:[#allocation3 + $0xf0] sm:$0xff]  ;;  %v84_v58 = vld [vmem:[#allocation3 + $0xf8] sm:$0xff] }
  0x25   :  { %v704_v59 = vpack.c.bf16 %v66_v56, %v65_v55  ;;  %v706_v60 = vpack.c.bf16 %v84_v58, %v83_v57  ;;  %v67_v61 = vld [vmem:[#allocation3 + $0x70] sm:$0xff]  ;;  %v68_v62 = vld [vmem:[#allocation3 + $0x78] sm:$0xff]  ;;  %v50_v0 = vld [vmem:[%s1013_s1 + $0x8] sm:$0xff] }
  0x26   :  { %v708_v63 = vpack.c.bf16 %v68_v62, %v67_v61  ;;  %v51_v1 = vld [vmem:[%s1013_s1 + $0x10] sm:$0xff]  ;;  %v52_v2 = vld [vmem:[%s1013_s1 + $0x18] sm:$0x3f]  ;;  %vm940_vm2 = vmpackc.low %vm247_vm0, %vm819_vm1 }
  0x27   :  { %v209_v40 = vld [vmem:[%s1015_s3 + $0x18] sm:$0x3f] }
  0x28   :  { %226 = vperm.xlu0 %748, %v212_v34   ;;  %231 = vperm.xlu1 %749, %v213_v35  }
  0x2a   :  { %689 = vmatpush3.bf16.xpose.msra.mxu0 %v688_v26 }
  0x2b   :  { %691 = vmatprep.subr.bf16.mxu0 %v690_v27 }
  0x2c   :  { %361 = vperm.xlu0 %748, %v355_v38   ;;  %366 = vperm.xlu1 %749, %v356_v39   ;;  %v207_v38 = vld [vmem:[%s1015_s3 + $0x8] sm:$0xff]  ;;  %v208_v39 = vld [vmem:[%s1015_s3 + $0x10] sm:$0xff] }
  0x30   :  { %371 = vperm.xlu0 %748, %v357_v44   ;;  %376 = vperm.xlu1 %749, %v358_v45  }
  0x32   :  { %693 = vmatpush3.bf16.xpose.msra.mxu0 %v692_v36 }
  0x33   :  { %695 = vmatprep.subr.bf16.mxu0 %v694_v37  ;;  %v206_v37 = vld [vmem:[%s1015_s3] sm:$0xff] }
  0x34   :  { %498 = vperm.xlu0 %748, %v495_v48  }
  0x3a   :  { %697 = vmatpush3.bf16.xpose.msra.mxu0 %v696_v46 }
  0x3b   :  { %699 = vmatprep.subr.bf16.mxu0 %v698_v47 }
  0x42   :  { %701 = vmatpush3.bf16.xpose.msra.mxu0 %v700_v53 }
  0x43   :  { %703 = vmatprep.subr.bf16.mxu0 %v702_v54 }
  0x4a   :  { %705 = vmatpush3.bf16.xpose.msra.mxu0 %v704_v59 }
  0x4b   :  { %707 = vmatprep.subr.bf16.mxu0 %v706_v60 }
  0x52   :  { %709 = vmatpush3.bf16.xpose.msra.mxu0 %v708_v63 }
  0x59   :  { %671 = vmatmul.mubr.f32.vlgmr.msra.gmra.mrb[0].mxu0 %v890_v17 }
  0x5a   :  { %672 = vmatprep.mubr.f32.mxu0 %v50_v0 }
  0x5d   :  { %673 = vmatmul.mubr.f32.gmra.mrb[2].mxu0 %v50_v0 }
  0x5e   :  { %674 = vmatprep.mubr.f32.mxu0 %v51_v1 }
  0x61   :  { %675 = vmatmul.mubr.f32.gmra.mrb[4].mxu0 %v51_v1 }
  0x62   :  { %676 = vmatprep.mubr.f32.mxu0 %v52_v2 }
  0x65   :  { %677 = vmatmul.mubr.f32.gmra.mrb[6].mxu0 %v52_v2 }
  0x9b   :  { %v92_v4 = vpop.permute.xlu0 %91  ;;  %v102_v13 = vpop.permute.xlu1 %101 }
  0x9f   :  { %v97_v9 = vpop.permute.xlu0 %96  ;;  %v107_v19 = vpop.permute.xlu1 %106 }
  0xa3   :  { %v217_v43 = vpop.permute.xlu0 %216  ;;  %v222_v45 = vpop.permute.xlu1 %221 }
  0xa7   :  { %v227_v58 = vpop.permute.xlu0 %226  ;;  %v232_v61 = vpop.permute.xlu1 %231 }
 0x12c   :  { %v175_v5 = vpop.f32.mrb[0].mxu0 }
 0x12d   :  { %v176_v6 = vadd.f32 %v175_v5, %v92_v4  ;;  %v177_v7 = vpop.f32.mrb[1].mxu0 }
 0x12e   :  { %v178_v8 = vadd.f32 %v177_v7, %v92_v4 }
 0x12f   :  { %750 = vtanh.f32 %v176_v6 }
 0x130   :  { %v181_v10 = vpop.f32.mrb[2].mxu0  ;;  %752 = vtanh.f32 %v178_v8 }
 0x131   :  { %v182_v11 = vadd.f32 %v181_v10, %v97_v9  ;;  %v183_v12 = vpop.f32.mrb[3].mxu0  ;;  %v351_v10 = vld [vmem:[%s1017_s5] sm:$0xff] }
 0x132   :  { %v184_v14 = vadd.f32 %v183_v12, %v97_v9  ;;  %v353_v12 = vld [vmem:[%s1017_s5 + $0x10] sm:$0xff] }
 0x133   :  { %754 = vtanh.f32 %v182_v11  ;;  %v352_v11 = vld [vmem:[%s1017_s5 + $0x8] sm:$0xff] }
 0x134   :  { %756 = vtanh.f32 %v184_v14  ;;  %v187_v15 = vpop.f32.mrb[4].mxu0 }
 0x135   :  { %v188_v16 = vadd.f32 %v187_v15, %v102_v13  ;;  %v189_v17 = vpop.f32.mrb[5].mxu0 }
 0x136   :  { %v190_v18 = vadd.f32 %v189_v17, %v102_v13  ;;  %v354_v13 = vld [vmem:[%s1017_s5 + $0x18] sm:$0x3f] }
 0x137   :  { %758 = vtanh.f32 %v188_v16  ;;  %v362_v16 = vpop.permute.xlu0 %361 }
 0x138   :  { %v193_v20 = vpop.f32.mrb[6].mxu0  ;;  %760 = vtanh.f32 %v190_v18  ;;  %v367_v18 = vpop.permute.xlu1 %366 }
 0x139   :  { %v194_v21 = vadd.f32 %v193_v20, %v107_v19  ;;  %v195_v22 = vpop.f32.mrb[7].mxu0  ;;  %v751_v24 = vpop.eup %750 }
 0x13a   :  { %v196_v23 = vadd.f32 %v195_v22, %v107_v19  ;;  %v753_v25 = vpop.eup %752 }
 0x13b   :  { %762 = vtanh.f32 %v194_v21 }
 0x13c   :  { %764 = vtanh.f32 %v196_v23 }
 0x13d   :  { %v755_v26 = vpop.eup %754 }
 0x13e   :  { %v757_v27 = vpop.eup %756  ;;  %v712_v28 = vpack.c.bf16 %v755_v26, %v751_v24 }
 0x13f   :  { %v710_v29 = vpack.c.bf16 %v757_v27, %v753_v25 }
 0x141   :  { %711 = vmatprep.subr.bf16.mxu1 %v710_v29  ;;  %v759_v30 = vpop.eup %758 }
 0x142   :  { %713 = vmatpush1.bf16.msra.mxu1 %v712_v28  ;;  %v761_v31 = vpop.eup %760 }
 0x145   :  { %v763_v32 = vpop.eup %762 }
 0x146   :  { %v765_v33 = vpop.eup %764  ;;  %v717_v35 = vpack.c.bf16 %v763_v32, %v759_v30 }
 0x147   :  { %v714_v36 = vpack.c.bf16 %v765_v33, %v761_v31  ;;  %v372_v31 = vpop.permute.xlu0 %371  ;;  %v377_v33 = vpop.permute.xlu1 %376 }
 0x149   :  { %716 = vmatprep.subr.msk.bf16.mxu1 %vm940_vm2, %v714_v36 }
 0x14a   :  { %719 = vmatpush1.bf16.msk.msra.mxu1 %vm940_vm2, %v717_v35 }
 0x14d   :  { %625 = vmatmul.mubr.msk.f32.vlgmr.msra.gmra.mrb[0].mxu1 %vm234_vm3, %v206_v37 }
 0x14e   :  { %324 = vmatprep.mubr.f32.mxu1 %v818_v3 }
 0x151   :  { %626 = vmatmul.mubr.msk.f32.gmra.mrb[2].mxu1 %vm234_vm3, %v207_v38 }
 0x152   :  { %330 = vmatprep.mubr.f32.mxu1 %v818_v3 }
 0x155   :  { %627 = vmatmul.mubr.msk.f32.gmra.mrb[4].mxu1 %vm234_vm3, %v208_v39 }
 0x156   :  { %336 = vmatprep.mubr.f32.mxu1 %v818_v3 }
 0x159   :  { %628 = vmatmul.mubr.msk.f32.gmra.mrb[6].mxu1 %vm234_vm3, %v209_v40 }
 0x15a   :  { %461 = vmatprep.mubr.f32.mxu1 %v818_v3 }
 0x220   :  { %v320_v41 = vpop.f32.mrb[0].mxu1 }
 0x221   :  { %v322_v42 = vpop.f32.mrb[1].mxu1  ;;  %v321_v44 = vadd.f32 %v320_v41, %v217_v43 }
 0x222   :  { %v323_v46 = vadd.f32 %v322_v42, %v217_v43 }
 0x223   :  { %v343_v51 = vmax.f32 %v321_v44, 0.0 }
 0x224   :  { %v326_v47 = vpop.f32.mrb[2].mxu1  ;;  %v344_v53 = vmax.f32 %v323_v46, 0.0  ;;  %v494_v46 = vld [vmem:[%s1019_s7] sm:$0x1]  ;;  %s788_s7 = scalar_lea.vmem %s615_s4, 32 }
 0x225   :  { %v327_v48 = vadd.f32 %v326_v47, %v222_v45  ;;  %v328_v49 = vpop.f32.mrb[3].mxu1  ;;  %v501_v47 = vlaneseq  ;;  %p789_p8 = scmp.ne.s32.totalorder %s615_s4, %s788_s7  ;;  %p794_p10 = scmp.lt.s32.totalorder %s788_s7, %s788_s7 }
 0x226   :  { %v329_v50 = vadd.f32 %v328_v49, %v222_v45  ;;  %v820_v49 = vmov 1966171168  }
 0x227   :  { %v345_v52 = vmax.f32 %v327_v48, 0.0  ;;  %v502_v48 = vshrl.u32 %v501_v47, 7  ;;  %vm605_vm4 = vcmp.lt.s32.totalorder %v501_v47, 256  ;;  %p795_p11 = por %p794_p10, %p793_p9 }
 0x228   :  { %v346_v54 = vmax.f32 %v329_v50, 0.0  ;;  %v332_v55 = vpop.f32.mrb[4].mxu1  ;;  %v589_v50 = vunpack.c.l.s4 %v820_v49 }
 0x229   :  { %v722_v56 = vpack.c.bf16 %v345_v52, %v343_v51  ;;  %v334_v57 = vpop.f32.mrb[5].mxu1  ;;  %v333_v60 = vadd.f32 %v332_v55, %v227_v58  ;;  %v503_v51 = vsub.s32 0, %v502_v48  ;;  %v499_v52 = vpop.permute.xlu0 %498  ;;  %p796_p12 = pnand %p795_p11, %p789_p8 }
 0x22a   :  { %v720_v59 = vpack.c.bf16 %v346_v54, %v344_v53  ;;  %v335_v62 = vadd.f32 %v334_v57, %v227_v58  ;;  %v590_v53 = vunpack.c.0.s8 %v589_v50 }
 0x22b   :  { %v347_v4 = vmax.f32 %v333_v60, 0.0  ;;  %v504_v54 = vrot.slane %v499_v52, %v503_v51 }
 0x22c   :  { %v338_v63 = vpop.f32.mrb[6].mxu1  ;;  %721 = vmatprep.subr.bf16.mxu1 %v720_v59  ;;  %v348_v6 = vmax.f32 %v335_v62, 0.0  ;;  %v593_v34 = vsub.s32 %v590_v53, %v502_v48 }
 0x22d   :  { %v339_v0 = vadd.f32 %v338_v63, %v232_v61  ;;  %v340_v1 = vpop.f32.mrb[7].mxu1  ;;  %723 = vmatpush1.bf16.msra.mxu1 %v722_v56 }
 0x22e   :  { %v341_v2 = vadd.f32 %v340_v1, %v232_v61 }
 0x22f   :  { %v349_v5 = vmax.f32 %v339_v0, 0.0 }
 0x230   :  { %v350_v7 = vmax.f32 %v341_v2, 0.0 }
 0x231   :  { %v727_v8 = vpack.c.bf16 %v349_v5, %v347_v4 }
 0x232   :  { %v724_v9 = vpack.c.bf16 %v350_v7, %v348_v6 }
 0x234   :  { %726 = vmatprep.subr.msk.bf16.mxu1 %vm940_vm2, %v724_v9 }
 0x235   :  { %729 = vmatpush1.bf16.msk.msra.mxu1 %vm940_vm2, %v727_v8 }
 0x238   :  { %631 = vmatmul.mubr.msk.f32.vlgmr.msra.gmra.mrb[8].mxu1 %vm234_vm3, %v351_v10 }
 0x239   :  { %467 = vmatprep.mubr.f32.mxu1 %v818_v3 }
 0x23c   :  { %632 = vmatmul.mubr.msk.f32.gmra.mrb[10].mxu1 %vm234_vm3, %v352_v11 }
 0x23d   :  { %473 = vmatprep.mubr.f32.mxu1 %v818_v3 }
 0x240   :  { %633 = vmatmul.mubr.msk.f32.gmra.mrb[12].mxu1 %vm234_vm3, %v353_v12 }
 0x241   :  { %479 = vmatprep.mubr.f32.mxu1 %v818_v3 }
 0x244   :  { %634 = vmatmul.mubr.msk.f32.gmra.mrb[14].mxu1 %vm234_vm3, %v354_v13 }
 0x245   :  { %578 = vmatprep.mubr.f32.mxu1 %v818_v3 }
 0x30b   :  { %v463_v14 = vpop.f32.mrb[8].mxu1 }
 0x30c   :  { %v465_v15 = vpop.f32.mrb[9].mxu1  ;;  %v464_v17 = vadd.f32 %v463_v14, %v362_v16 }
 0x30d   :  { %v466_v19 = vadd.f32 %v465_v15, %v362_v16 }
 0x30e   :  { %v486_v24 = vmax.f32 %v464_v17, 0.0 }
 0x30f   :  { %v469_v20 = vpop.f32.mrb[10].mxu1  ;;  %v487_v26 = vmax.f32 %v466_v19, 0.0 }
 0x310   :  { %v470_v21 = vadd.f32 %v469_v20, %v367_v18  ;;  %v471_v22 = vpop.f32.mrb[11].mxu1 }
 0x311   :  { %v472_v23 = vadd.f32 %v471_v22, %v367_v18 }
 0x312   :  { %v488_v25 = vmax.f32 %v470_v21, 0.0 }
 0x313   :  { %v489_v27 = vmax.f32 %v472_v23, 0.0  ;;  %v475_v28 = vpop.f32.mrb[12].mxu1 }
 0x314   :  { %v732_v29 = vpack.c.bf16 %v488_v25, %v486_v24  ;;  %v477_v30 = vpop.f32.mrb[13].mxu1  ;;  %v476_v3 = vadd.f32 %v475_v28, %v372_v31 }
 0x315   :  { %v730_v32 = vpack.c.bf16 %v489_v27, %v487_v26  ;;  %v478_v35 = vadd.f32 %v477_v30, %v372_v31 }
 0x316   :  { %v490_v40 = vmax.f32 %v476_v3, 0.0 }
 0x317   :  { %v481_v36 = vpop.f32.mrb[14].mxu1  ;;  %731 = vmatprep.subr.bf16.mxu1 %v730_v32  ;;  %v491_v42 = vmax.f32 %v478_v35, 0.0 }
 0x318   :  { %v482_v37 = vadd.f32 %v481_v36, %v377_v33  ;;  %v483_v38 = vpop.f32.mrb[15].mxu1  ;;  %733 = vmatpush1.bf16.msra.mxu1 %v732_v29 }
 0x319   :  { %v484_v39 = vadd.f32 %v483_v38, %v377_v33 }
 0x31a   :  { %v492_v41 = vmax.f32 %v482_v37, 0.0 }
 0x31b   :  { %v493_v43 = vmax.f32 %v484_v39, 0.0 }
 0x31c   :  { %v737_v44 = vpack.c.bf16 %v492_v41, %v490_v40 }
 0x31d   :  { %v734_v45 = vpack.c.bf16 %v493_v43, %v491_v42 }
 0x31f   :  { %736 = vmatprep.subr.msk.bf16.mxu1 %vm940_vm2, %v734_v45 }
 0x320   :  { %739 = vmatpush1.bf16.msk.msra.mxu1 %vm940_vm2, %v737_v44 }
 0x323   :  { %637 = vmatmul.mubr.msk.f32.vlgmr.msra.gmra.mrb[16].mxu1 %vm234_vm3, %v494_v46 }
 0x3f6   :  { %v580_v55 = vpop.f32.mrb[16].mxu1 }
 0x3f7   :  { %v581_v56 = vadd.f32 %v580_v55, %v504_v54  ;;  %v582_v57 = vpop.f32.mrb[17].mxu1 }
 0x3f8   :  { %v583_v58 = vadd.f32 %v582_v57, %v504_v54 }
 0x3fa   :  { %v587_v59 = vcombine.low %v581_v56, %v583_v58 }
 0x3fc   :  { %v594_v60 = vrot.slane %v587_v59, %v593_v34 }
 0x3fe   :  { %v601_v61 = vrot.slane %v594_v60, %v593_v34 }
 0x400   :  { %607 = vst.msk [vmem:[#allocation6] sm:$0x3] %vm605_vm4, %v601_v61 }
 0x401   :  { %799 = shalt.err (!%p796_p12)
}
 0x402   :  { %s800_s0 = scalar_lea.hbm %s1021_s9, 32 }
 0x403   :  { %p801_p13 = scmp.ne.s32.totalorder %s1021_s9, %s800_s0  ;;  %p804_p0 = scmp.lt.u32.totalorder %s800_s0, %s1021_s9 }
 0x405   :  { %p806_p1 = pnand %p804_p0, %p801_p13 }
 0x407   :  { %809 = shalt.err (!%p806_p1)
}
 0x408   :  { %617 = dma.vmem_to_hbm [thread:$0]  %s615_s4, 32, %s1021_s9, [#allocation5]  }
 0x409   :  { %812 = dma.done.wait [#allocation5], 32  }
 0x40a   :  { %813 = vsyncadd [#allocation5], 4294967264 }
 0x40b   :  { %621 = vsyncpa [#allocation4], 1 }
 0x40c   :  { %622 = vsyncpa [#allocation5], 1 }

</bundles_post_ra>
